<compile_context>
chip_gen: v7x
topology: tpu7x:2x2x1
jax: 0.10.0
libtpu: 0.0.40
codegen_flags: <defaults>
</compile_context>

<pallas_src>
import jax
import jax.numpy as jnp
from jax.experimental import pallas as pl
from jax.experimental.pallas import tpu as pltpu


# --------------------------------------------------------------------------- #
# kernel
# --------------------------------------------------------------------------- #
def _fused_kernel(img_ref, q_ref, wi_ref, bi_ref, wt_ref, bt_ref, o_ref):
    wi = wi_ref[...]                 # (di, tn)  matmul dtype (bf16 or f32)
    wt = wt_ref[...]                 # (dq, tn)
    bi = bi_ref[...]                 # (1, tn)   f32
    bt = bt_ref[...]                 # (1, tn)   f32

    # question branch: (B_blk, dq) @ (dq, tn) on the MXU, f32 accumulation.
    q = q_ref[...].astype(wt.dtype)
    q_fa = jnp.maximum(
        jnp.dot(q, wt, preferred_element_type=jnp.float32) + bt, 0.0)

    if len(img_ref.shape) == 3:
        bb, nloc, di = img_ref.shape
        # nloc is padded to a multiple of 8 by the wrapper, so merging the two
        # leading (major) dims never crosses an (8, 128) tile boundary and the
        # reshape stays a cheap relabeling (lane axis untouched).
        img2 = img_ref[...].astype(wi.dtype).reshape(bb * nloc, di)
        image_fa = jnp.maximum(
            jnp.dot(img2, wi, preferred_element_type=jnp.float32) + bi, 0.0)
        joint = image_fa.reshape(bb, nloc, -1) * q_fa[:, None, :]
    else:
        img = img_ref[...].astype(wi.dtype)
        image_fa = jnp.maximum(
            jnp.dot(img, wi, preferred_element_type=jnp.float32) + bi, 0.0)
        joint = image_fa * q_fa

    # TODO(synk): nn.Dropout is identity at inference; training-mode dropout
    # (stateful PRNG mask + rescale) is not implemented here.
    o_ref[...] = joint.astype(o_ref.dtype)


# --------------------------------------------------------------------------- #
# tiling / VMEM planning
# --------------------------------------------------------------------------- #
def _round_up(x, m):
    return (x + m - 1) // m * m


def _vmem_budget_bytes():
    """Per-TensorCore VMEM budget for weights + pipelined tiles (with headroom).

    Generation-aware: 64 MiB on v7x, 128 MiB on v5e/v6e; we use 3/4 of it and
    leave the rest for Mosaic internal scratch / semaphores.
    """
    try:
        cap = int(pltpu.get_tpu_info().vmem_capacity_bytes)
    except Exception:  # interpret mode / query unavailable
        cap = 128 * 1024 * 1024
    return cap * 3 // 4


def _plan_tiling(batch, nloc, di, dq, hidden_p, in_bytes, w_bytes, out_bytes):
    """Pick (batch block, hidden block, single-buffer-weights?, vmem_limit)."""
    budget = _vmem_budget_bytes()
    bias_col_bytes = 2 * 4  # two f32 bias rows, per hidden column

    def weight_bytes(tn, nbuf):
        return nbuf * tn * ((di + dq) * w_bytes + bias_col_bytes)

    # Hidden tiling: keep resident weights within ~half the budget.
    if weight_bytes(hidden_p, 1) <= budget // 2:
        tn = hidden_p                       # full hidden, constant index_map
        single_buffer_w = True              # -> 1 VMEM copy of the weights
        w_resident = weight_bytes(tn, 1)
    else:
        single_buffer_w = False             # weight tile changes per step
        tn = 128
        for cand in (4096, 2048, 1024, 512, 256):
            if cand <= hidden_p and weight_bytes(cand, 2) <= budget // 2:
                tn = cand
                break
        w_resident = weight_bytes(tn, 2)

    # Batch block: double-buffered (pipelined) image / question / output tiles
    # in whatever VMEM remains.  Intermediates live in vregs, not counted.
    per_row = 2 * (nloc * di * in_bytes + dq * in_bytes + nloc * tn * out_bytes)
    remaining = max(budget - w_resident, 8 * per_row)
    b_blk = max(1, remaining // per_row)
    if batch <= 8 or batch <= b_blk:
        b_blk = batch                       # full-extent block: always legal
    else:
        b_blk = max(8, (min(b_blk, batch) // 8) * 8)   # (8,128) legal

    usage = w_resident + b_blk * per_row
    vmem_limit = int(min(budget, max(usage + (4 << 20), 32 << 20)))
    return int(b_blk), int(tn), single_buffer_w, vmem_limit


def _maybe_single_buffered_spec(shape, index_map, single_buffer):
    """Constant-index weight/bias specs only need one VMEM buffer."""
    if single_buffer:
        try:
            return pl.BlockSpec(shape, index_map, pipeline_mode=pl.Buffered(1))
        except (TypeError, AttributeError):   # older jax without pipeline_mode
            pass
    return pl.BlockSpec(shape, index_map)


# --------------------------------------------------------------------------- #
# wrapper
# --------------------------------------------------------------------------- #
def non_linear_elmt_multiply(image_feat, question_embedding,
                             w_img, b_img, w_txt, b_txt,
                             *, matmul_dtype=jnp.bfloat16,
                             batch_block=None, hidden_block=None):
    """Fused Pallas implementation of non_linear_elmt_multiply.forward (eval)."""
    if image_feat.ndim not in (2, 3):
        raise ValueError("image_feat must be 2-D or 3-D")
    batch = image_feat.shape[0]
    di = image_feat.shape[-1]
    dq = question_embedding.shape[-1]
    hidden = w_img.shape[-1]
    assert w_img.shape == (di, hidden)
    assert w_txt.shape == (dq, hidden)
    assert question_embedding.shape[0] == batch

    is_3d = image_feat.ndim == 3
    nloc = image_feat.shape[1] if is_3d else 1
    out_dtype = image_feat.dtype

    # Pad hidden -> multiple of 128 (lane-dense, unmasked vst) and, for the
    # 3-D path, num_loc -> multiple of 8 (clean sublane merge in the reshape).
    hidden_p = _round_up(hidden, 128)
    nloc_p = _round_up(nloc, 8) if is_3d else 1

    def pad_cols(x, target):
        if x.shape[-1] == target:
            return x
        return jnp.pad(x, [(0, 0)] * (x.ndim - 1) + [(0, target - x.shape[-1])])

    wi = pad_cols(w_img, hidden_p).astype(matmul_dtype)   # cast once in wrapper
    wt = pad_cols(w_txt, hidden_p).astype(matmul_dtype)
    bi2 = pad_cols(b_img.reshape(1, hidden), hidden_p).astype(jnp.float32)
    bt2 = pad_cols(b_txt.reshape(1, hidden), hidden_p).astype(jnp.float32)

    img = image_feat
    if is_3d and nloc_p != nloc:
        img = jnp.pad(img, ((0, 0), (0, nloc_p - nloc), (0, 0)))

    b_blk, tn, single_w, vmem_limit = _plan_tiling(
        batch, nloc_p, di, dq, hidden_p,
        in_bytes=image_feat.dtype.itemsize,
        w_bytes=wi.dtype.itemsize,
        out_bytes=jnp.zeros((), out_dtype).dtype.itemsize)

    if batch_block is not None:
        b_blk = batch if batch_block >= batch else max(8, (batch_block // 8) * 8)
    if hidden_block is not None:
        tn = min(hidden_p, _round_up(hidden_block, 128))
        single_w = single_w and (tn == hidden_p)

    grid = (pl.cdiv(batch, b_blk), pl.cdiv(hidden_p, tn))

    if is_3d:
        img_spec = pl.BlockSpec((b_blk, nloc_p, di), lambda b, n: (b, 0, 0))
        out_spec = pl.BlockSpec((b_blk, nloc_p, tn), lambda b, n: (b, 0, n))
        out_shape = jax.ShapeDtypeStruct((batch, nloc_p, hidden_p), out_dtype)
    else:
        img_spec = pl.BlockSpec((b_blk, di), lambda b, n: (b, 0))
        out_spec = pl.BlockSpec((b_blk, tn), lambda b, n: (b, n))
        out_shape = jax.ShapeDtypeStruct((batch, hidden_p), out_dtype)

    q_spec = pl.BlockSpec((b_blk, dq), lambda b, n: (b, 0))
    wi_spec = _maybe_single_buffered_spec((di, tn), lambda b, n: (0, n), single_w)
    bi_spec = _maybe_single_buffered_spec((1, tn), lambda b, n: (0, n), single_w)
    wt_spec = _maybe_single_buffered_spec((dq, tn), lambda b, n: (0, n), single_w)
    bt_spec = _maybe_single_buffered_spec((1, tn), lambda b, n: (0, n), single_w)

    # Advisory cost estimate so XLA can schedule/overlap the custom call.
    flops = 2 * batch * (nloc_p * di + dq) * hidden_p
    bytes_accessed = (
        img.size * img.dtype.itemsize
        + question_embedding.size * question_embedding.dtype.itemsize
        + (wi.size + wt.size) * wi.dtype.itemsize
        + (bi2.size + bt2.size) * 4
        + batch * (nloc_p if is_3d else 1) * hidden_p
        * jnp.zeros((), out_dtype).dtype.itemsize)
    cost = pl.CostEstimate(flops=flops, transcendentals=0,
                           bytes_accessed=int(bytes_accessed))

    out = pl.pallas_call(
        _fused_kernel,
        out_shape=out_shape,
        grid=grid,
        in_specs=[img_spec, q_spec, wi_spec, bi_spec, wt_spec, bt_spec],
        out_specs=out_spec,
        compiler_params=pltpu.CompilerParams(
            dimension_semantics=("parallel", "parallel"),
            vmem_limit_bytes=vmem_limit),
        cost_estimate=cost,
    )(img, question_embedding, wi, bi2, wt, bt2)

    # Slice off the alignment padding (no-op when shapes were already aligned).
    if is_3d:
        if nloc_p != nloc or hidden_p != hidden:
            out = out[:, :nloc, :hidden]
    else:
        if hidden_p != hidden:
            out = out[:, :hidden]
    return out


# --------------------------------------------------------------------------- #
# pure-JAX reference & self-test
# --------------------------------------------------------------------------- #
def _reference(image_feat, question_embedding, w_img, b_img, w_txt, b_txt):
    """Pure-JAX reference mirroring the PyTorch forward (eval mode), f32."""
    image_fa = jax.nn.relu(image_feat @ w_img + b_img)
    question_fa = jax.nn.relu(question_embedding @ w_txt + b_txt)
    if image_feat.ndim == 3:
        question_fa = question_fa[:, None, :]
    return image_fa * question_fa


if __name__ == "__main__":
    key = jax.random.PRNGKey(0)
    batch, num_loc = 2, 8
    image_feat_dim, ques_emb_dim, hidden_size = 64, 32, 128

    ks = jax.random.split(key, 7)
    w_img = 0.05 * jax.random.normal(ks[0], (image_feat_dim, hidden_size), jnp.float32)
    b_img = 0.05 * jax.random.normal(ks[1], (hidden_size,), jnp.float32)
    w_txt = 0.05 * jax.random.normal(ks[2], (ques_emb_dim, hidden_size), jnp.float32)
    b_txt = 0.05 * jax.random.normal(ks[3], (hidden_size,), jnp.float32)

    image_feat_3d = jax.random.normal(ks[4], (batch, num_loc, image_feat_dim), jnp.float32)
    image_feat_2d = jax.random.normal(ks[5], (batch, image_feat_dim), jnp.float32)
    question_emb = jax.random.normal(ks[6], (batch, ques_emb_dim), jnp.float32)

    ref3 = _reference(image_feat_3d, question_emb, w_img, b_img, w_txt, b_txt)
    ref2 = _reference(image_feat_2d, question_emb, w_img, b_img, w_txt, b_txt)

    # Exact-precision path (f32 MXU operands).
    out3_f32 = jax.block_until_ready(non_linear_elmt_multiply(
        image_feat_3d, question_emb, w_img, b_img, w_txt, b_txt,
        matmul_dtype=jnp.float32))
    out2_f32 = jax.block_until_ready(non_linear_elmt_multiply(
        image_feat_2d, question_emb, w_img, b_img, w_txt, b_txt,
        matmul_dtype=jnp.float32))
    assert out3_f32.shape == (batch, num_loc, hidden_size)
    assert out2_f32.shape == (batch, hidden_size)
    assert jnp.allclose(out3_f32, ref3, atol=1e-5, rtol=1e-5)
    assert jnp.allclose(out2_f32, ref2, atol=1e-5, rtol=1e-5)

    # Default fast path (bf16 MXU operands, f32 accumulation / elementwise):
    # small, expected numeric deviation vs the f32 reference.
    out3_bf = jax.block_until_ready(non_linear_elmt_multiply(
        image_feat_3d, question_emb, w_img, b_img, w_txt, b_txt))
    out2_bf = jax.block_until_ready(non_linear_elmt_multiply(
        image_feat_2d, question_emb, w_img, b_img, w_txt, b_txt))
    assert out3_bf.shape == (batch, num_loc, hidden_size)
    assert out2_bf.shape == (batch, hidden_size)
    assert jnp.allclose(out3_bf, ref3, atol=2e-2, rtol=2e-2)
    assert jnp.allclose(out2_bf, ref2, atol=2e-2, rtol=2e-2)

    # Unaligned hidden / num_loc exercise the padding path (hidden=96, nloc=6).
    hidden_u, nloc_u = 96, 6
    w_img_u = 0.05 * jax.random.normal(ks[0], (image_feat_dim, hidden_u), jnp.float32)
    b_img_u = 0.05 * jax.random.normal(ks[1], (hidden_u,), jnp.float32)
    w_txt_u = 0.05 * jax.random.normal(ks[2], (ques_emb_dim, hidden_u), jnp.float32)
    b_txt_u = 0.05 * jax.random.normal(ks[3], (hidden_u,), jnp.float32)
    image_feat_u = jax.random.normal(ks[4], (batch, nloc_u, image_feat_dim), jnp.float32)
    out_u = jax.block_until_ready(non_linear_elmt_multiply(
        image_feat_u, question_emb, w_img_u, b_img_u, w_txt_u, b_txt_u,
        matmul_dtype=jnp.float32))
    ref_u = _reference(image_feat_u, question_emb, w_img_u, b_img_u, w_txt_u, b_txt_u)
    assert out_u.shape == (batch, nloc_u, hidden_u)
    assert jnp.allclose(out_u, ref_u, atol=1e-5, rtol=1e-5)

    print("KERNEL_OK")
</pallas_src>

<mosaic_0001>
module attributes {stable_mosaic.version = 11 : i64} {
  func.func @_fused_kernel(%arg0: i32, %arg1: i32, %arg2: memref<2x8x64xf32, #tpu.memory_space<vmem>>, %arg3: memref<2x32xf32, #tpu.memory_space<vmem>>, %arg4: memref<64x128xf32, #tpu.memory_space<vmem>>, %arg5: memref<1x128xf32, #tpu.memory_space<vmem>>, %arg6: memref<32x128xf32, #tpu.memory_space<vmem>>, %arg7: memref<1x128xf32, #tpu.memory_space<vmem>>, %arg8: memref<2x8x128xf32, #tpu.memory_space<vmem>>) attributes {dimension_semantics = [#tpu.dimension_semantics<parallel>, #tpu.dimension_semantics<parallel>], iteration_bounds = array<i64: 1, 1>, scalar_prefetch = 0 : i64, scratch_operands = 0 : i64, tpu.core_type = #tpu.core_type<tc>, window_params = [{transform_indices = @transform_0, window_bounds = array<i64: 2, 8, 64>}, {transform_indices = @transform_1, window_bounds = array<i64: 2, 32>}, {pipeline_mode = #tpu.pipeline_mode<synchronous>, transform_indices = @transform_2, window_bounds = array<i64: 64, 128>}, {pipeline_mode = #tpu.pipeline_mode<synchronous>, transform_indices = @transform_3, window_bounds = array<i64: 1, 128>}, {pipeline_mode = #tpu.pipeline_mode<synchronous>, transform_indices = @transform_4, window_bounds = array<i64: 32, 128>}, {pipeline_mode = #tpu.pipeline_mode<synchronous>, transform_indices = @transform_5, window_bounds = array<i64: 1, 128>}, {transform_indices = @transform_6, window_bounds = array<i64: 2, 8, 128>}]} {
    %c0 = arith.constant 0 : index
    %c0_0 = arith.constant 0 : index
    %0 = vector.load %arg4[%c0, %c0_0] : memref<64x128xf32, #tpu.memory_space<vmem>>, vector<64x128xf32>
    %c0_1 = arith.constant 0 : index
    %c0_2 = arith.constant 0 : index
    %1 = vector.load %arg6[%c0_1, %c0_2] : memref<32x128xf32, #tpu.memory_space<vmem>>, vector<32x128xf32>
    %c0_3 = arith.constant 0 : index
    %c0_4 = arith.constant 0 : index
    %2 = vector.load %arg5[%c0_3, %c0_4] : memref<1x128xf32, #tpu.memory_space<vmem>>, vector<1x128xf32>
    %c0_5 = arith.constant 0 : index
    %c0_6 = arith.constant 0 : index
    %3 = vector.load %arg7[%c0_5, %c0_6] : memref<1x128xf32, #tpu.memory_space<vmem>>, vector<1x128xf32>
    %c0_7 = arith.constant 0 : index
    %c0_8 = arith.constant 0 : index
    %4 = vector.load %arg3[%c0_7, %c0_8] : memref<2x32xf32, #tpu.memory_space<vmem>>, vector<2x32xf32>
    %cst = arith.constant dense<0.000000e+00> : vector<2x128xf32>
    %5 = tpu.matmul %4, %1, %cst {dimension_numbers = #tpu.dot_dimension_numbers<[1], [0], [0], [1], [0, 0, 1, 1], [], []>} : vector<2x32xf32>, vector<32x128xf32>, vector<2x128xf32> -> vector<2x128xf32>
    %6 = vector.broadcast %3 : vector<1x128xf32> to vector<2x128xf32>
    %7 = arith.addf %5, %6 : vector<2x128xf32>
    %cst_9 = arith.constant 0.000000e+00 : f32
    %8 = vector.broadcast %cst_9 : f32 to vector<2x128xf32>
    %9 = arith.maximumf %7, %8 : vector<2x128xf32>
    %c0_10 = arith.constant 0 : index
    %c0_11 = arith.constant 0 : index
    %c0_12 = arith.constant 0 : index
    %10 = vector.load %arg2[%c0_10, %c0_11, %c0_12] : memref<2x8x64xf32, #tpu.memory_space<vmem>>, vector<2x8x64xf32>
    %11 = vector.shape_cast %10 : vector<2x8x64xf32> to vector<16x64xf32>
    %cst_13 = arith.constant dense<0.000000e+00> : vector<16x128xf32>
    %12 = tpu.matmul %11, %0, %cst_13 {dimension_numbers = #tpu.dot_dimension_numbers<[1], [0], [0], [1], [0, 0, 1, 1], [], []>} : vector<16x64xf32>, vector<64x128xf32>, vector<16x128xf32> -> vector<16x128xf32>
    %13 = vector.broadcast %2 : vector<1x128xf32> to vector<16x128xf32>
    %14 = arith.addf %12, %13 : vector<16x128xf32>
    %cst_14 = arith.constant 0.000000e+00 : f32
    %15 = vector.broadcast %cst_14 : f32 to vector<16x128xf32>
    %16 = arith.maximumf %14, %15 : vector<16x128xf32>
    %17 = vector.shape_cast %16 : vector<16x128xf32> to vector<2x8x128xf32>
    %18 = vector.shape_cast %9 : vector<2x128xf32> to vector<2x1x128xf32>
    %19 = vector.broadcast %18 : vector<2x1x128xf32> to vector<2x8x128xf32>
    %20 = arith.mulf %17, %19 : vector<2x8x128xf32>
    %c0_15 = arith.constant 0 : index
    %c0_16 = arith.constant 0 : index
    %c0_17 = arith.constant 0 : index
    %21 = vector.load %arg8[%c0_15, %c0_16, %c0_17] : memref<2x8x128xf32, #tpu.memory_space<vmem>>, vector<2x8x128xf32>
    tpu.vector_store %arg8[%c0_15, %c0_16, %c0_17], %20 {strides = array<i32>} : memref<2x8x128xf32, #tpu.memory_space<vmem>>, vector<2x8x128xf32>,
    return
  }
  func.func @transform_0(%arg0: i32, %arg1: i32) -> (i32, i32, i32) {
    %c0_i32 = arith.constant 0 : i32
    %c0_i32_0 = arith.constant 0 : i32
    %c0_i32_1 = arith.constant 0 : i32
    return %arg0, %c0_i32, %c0_i32_0 : i32, i32, i32
  }
  func.func @transform_1(%arg0: i32, %arg1: i32) -> (i32, i32) {
    %c0_i32 = arith.constant 0 : i32
    %c0_i32_0 = arith.constant 0 : i32
    return %arg0, %c0_i32 : i32, i32
  }
  func.func @transform_2(%arg0: i32, %arg1: i32) -> (i32, i32) {
    %c0_i32 = arith.constant 0 : i32
    %c0_i32_0 = arith.constant 0 : i32
    return %c0_i32, %arg1 : i32, i32
  }
  func.func @transform_3(%arg0: i32, %arg1: i32) -> (i32, i32) {
    %c0_i32 = arith.constant 0 : i32
    %c0_i32_0 = arith.constant 0 : i32
    return %c0_i32, %arg1 : i32, i32
  }
  func.func @transform_4(%arg0: i32, %arg1: i32) -> (i32, i32) {
    %c0_i32 = arith.constant 0 : i32
    %c0_i32_0 = arith.constant 0 : i32
    return %c0_i32, %arg1 : i32, i32
  }
  func.func @transform_5(%arg0: i32, %arg1: i32) -> (i32, i32) {
    %c0_i32 = arith.constant 0 : i32
    %c0_i32_0 = arith.constant 0 : i32
    return %c0_i32, %arg1 : i32, i32
  }
  func.func @transform_6(%arg0: i32, %arg1: i32) -> (i32, i32, i32) {
    %c0_i32 = arith.constant 0 : i32
    %c0_i32_0 = arith.constant 0 : i32
    return %arg0, %c0_i32, %arg1 : i32, i32, i32
  }
}

</mosaic_0001>

<bundles_post_ra>
// kernel: tpu_custom_call.1
= control target key start
LH: loop header
LB: loop body
LE: loop exit
PB: predicated region body
PF: predicated region fallthrough
CT: control target
= control target key end

     0   :  { %11 = vsyncpa [#allocation3], 0  ;;  %s607_s0 = inlined_call_operand.hbm [shape: f32[2,8,64], index: 0, kind: input, shape index: {}]   ;;  %s608_s1 = inlined_call_operand.vmem [shape: f32[2,32], index: 1, kind: input, shape index: {}]   ;;  %s609_s2 = inlined_call_operand.hbm [shape: f32[64,128], index: 2, kind: input, shape index: {}]   ;;  %s610_s3 = inlined_call_operand.vmem [shape: f32[1,128], index: 3, kind: input, shape index: {}]   ;;  %s611_s4 = inlined_call_operand.hbm [shape: f32[32,128], index: 4, kind: input, shape index: {}]   ;;  %s612_s5 = inlined_call_operand.vmem [shape: f32[1,128], index: 5, kind: input, shape index: {}]   ;;  %s613_s6 = inlined_call_operand.hbm [shape: f32[2,8,128], index: 6, kind: output, shape index: {}]  }
   0x1   :  { %12 = vsyncpa [#allocation6], 0 }
   0x2   :  { %13 = vsyncpa [#allocation4], 0  ;;  %s484_s21 = smov [#allocation5]   ;;  %s485_s23 = smov [#allocation2]  }
   0x3   :  { %s33_s22 = sshll.u32 %s484_s21, 4  ;;  %s19_s24 = sshll.u32 %s485_s23, 4  ;;  %s34_s22 = int_to_ptr.vmem [resolvable:$true] %s33_s22  ;;  %s529_s24 = int_to_ptr.vmem [resolvable:$true] %s19_s24 }
   0x4   :  { %s390_s27 = scalar_lea.hbm %s609_s2, 1024 }
   0x5   :  { %p391_p0 = scmp.ne.s32.totalorder %s609_s2, %s390_s27  ;;  %p394_p1 = scmp.lt.u32.totalorder %s390_s27, %s609_s2 }
   0x7   :  { %p396_p2 = pnand %p394_p1, %p391_p0 }
   0x9   :  { %399 = shalt.err (!%p396_p2)
}
   0xa   :  { %s400_s8 = scalar_lea.vmem %s34_s22, 1024  ;;  %p405_p4 = scmp.lt.s32.totalorder %s34_s22, %s34_s22 }
   0xb   :  { %p401_p3 = scmp.ne.s32.totalorder %s34_s22, %s400_s8  ;;  %p406_p5 = scmp.lt.s32.totalorder %s400_s8, %s400_s8 }
   0xd   :  { %p407_p6 = por %p406_p5, %p405_p4 }
   0xf   :  { %p408_p7 = pnand %p407_p6, %p401_p3 }
  0x11   :  { %411 = shalt.err (!%p408_p7)
}
  0x12   :  { %s486_s9 = smov 128   ;;  %s487_s10 = smov 8  }
  0x13   :  { %39 = dma.hbm_to_vmem [thread:$0]  %s609_s2, 1024, %s34_s22, [#allocation6], %s486_s9, %s486_s9, %s487_s10  }
  0x14   :  { %s412_s15 = scalar_lea.hbm %s607_s0, 256 }
  0x15   :  { %p413_p8 = scmp.ne.s32.totalorder %s607_s0, %s412_s15  ;;  %p416_p9 = scmp.lt.u32.totalorder %s412_s15, %s607_s0 }
  0x17   :  { %p418_p10 = pnand %p416_p9, %p413_p8 }
  0x19   :  { %421 = shalt.err (!%p418_p10)
}
  0x1a   :  { %s422_s20 = scalar_lea.vmem %s529_s24, 256  ;;  %p427_p12 = scmp.lt.s32.totalorder %s529_s24, %s529_s24 }
  0x1b   :  { %p423_p11 = scmp.ne.s32.totalorder %s529_s24, %s422_s20  ;;  %p428_p13 = scmp.lt.s32.totalorder %s422_s20, %s422_s20 }
  0x1d   :  { %p429_p0 = por %p428_p13, %p427_p12 }
  0x1f   :  { %p430_p1 = pnand %p429_p0, %p423_p11 }
  0x21   :  { %433 = shalt.err (!%p430_p1)
}
  0x22   :  { %25 = dma.hbm_to_vmem [thread:$0]  %s607_s0, 256, %s529_s24, [#allocation3], %s486_s9, %s486_s9, %s487_s10  }
  0x23   :  { %s488_s22 = smov [#allocation7]   ;;  %s434_s27 = scalar_lea.hbm %s611_s4, 512 }
  0x24   :  { %s47_s23 = sshll.u32 %s488_s22, 4  ;;  %p435_p2 = scmp.ne.s32.totalorder %s611_s4, %s434_s27  ;;  %s48_s23 = int_to_ptr.vmem [resolvable:$true] %s47_s23 }
  0x25   :  { %p438_p3 = scmp.lt.u32.totalorder %s434_s27, %s611_s4 }
  0x27   :  { %p440_p4 = pnand %p438_p3, %p435_p2 }
  0x29   :  { %443 = shalt.err (!%p440_p4)
}
  0x2a   :  { %s444_s8 = scalar_lea.vmem %s48_s23, 512  ;;  %p449_p6 = scmp.lt.s32.totalorder %s48_s23, %s48_s23 }
  0x2b   :  { %p445_p5 = scmp.ne.s32.totalorder %s48_s23, %s444_s8  ;;  %p450_p7 = scmp.lt.s32.totalorder %s444_s8, %s444_s8 }
  0x2d   :  { %p451_p8 = por %p450_p7, %p449_p6 }
  0x2f   :  { %p452_p9 = pnand %p451_p8, %p445_p5 }
  0x31   :  { %455 = shalt.err (!%p452_p9)
}
  0x32   :  { %53 = dma.hbm_to_vmem [thread:$0]  %s611_s4, 512, %s48_s23, [#allocation6], %s486_s9, %s486_s9, %s487_s10  }
  0x33   :  { %478 = dma.done.wait [#allocation3], 256  }
  0x34   :  { %479 = vsyncadd [#allocation3], 4294967040 }
  0x35   :  { %480 = dma.done.wait [#allocation6], 1536  }
  0x36   :  { %481 = vsyncadd [#allocation6], 4294965760  ;;  %v489_v0 = vmov 0.0|0.0   ;;  %vm490_vm0 = vmmov 0   ;;  %v491_v1 = vmov 0.0   ;;  %v65_v2 = vld [vmem:[#allocation5] sm:$0xff]  ;;  %v257_v25 = vlaneseq }
  0x37   :  { %358 = vmatprep.subr.bf16.mxu0 %v489_v0  ;;  %336 = vmatprep.mubr.msk.f32.mxu0 %vm490_vm0, %v491_v1  ;;  %v66_v3 = vld [vmem:[#allocation5 + $0x8] sm:$0xff]  ;;  %v73_v4 = vld [vmem:[#allocation7] sm:$0xff]  ;;  %v67_v7 = vld [vmem:[#allocation5 + $0x10] sm:$0xff]  ;;  %vm169_vm1 = vcmask 523264   ;;  %vm86_vm2 = vcmask 261120  }
  0x38   :  { %v364_v5 = vpack.c.bf16 %v66_v3, %v65_v2  ;;  %v74_v6 = vld [vmem:[#allocation7 + $0x8] sm:$0xff]  ;;  %v68_v8 = vld [vmem:[#allocation5 + $0x18] sm:$0xff]  ;;  %v75_v11 = vld [vmem:[#allocation7 + $0x10] sm:$0xff]  ;;  %v492_v23 = vmov 1966171168   ;;  %v258_v27 = vshrl.u32 %v257_v25, 7 }
  0x39   :  { %v359_v9 = vpack.c.bf16 %v74_v6, %v73_v4  ;;  %v368_v10 = vpack.c.bf16 %v68_v8, %v67_v7  ;;  %v76_v12 = vld [vmem:[#allocation7 + $0x18] sm:$0xff]  ;;  %v69_v13 = vld [vmem:[#allocation5 + $0x20] sm:$0xff]  ;;  %v70_v14 = vld [vmem:[#allocation5 + $0x28] sm:$0xff]  ;;  %v255_v24 = vunpack.c.l.s4 %v492_v23 }
  0x3a   :  { %365 = vmatprep.subr.bf16.mxu1 %v364_v5  ;;  %v362_v15 = vpack.c.bf16 %v76_v12, %v75_v11  ;;  %v161_v16 = vld [vmem:[#allocation2] sm:$0xff]  ;;  %v372_v17 = vpack.c.bf16 %v70_v14, %v69_v13  ;;  %v72_v19 = vld [vmem:[#allocation5 + $0x38] sm:$0xff]  ;;  %v278_v37 = vsub.s32 0, %v258_v27 }
  0x3b   :  { %360 = vmatpush3.bf16.msra.mxu0 %v359_v9  ;;  %367 = vmatpush3.bf16.msra.mxu1 %v364_v5  ;;  %v71_v18 = vld [vmem:[#allocation5 + $0x30] sm:$0xff]  ;;  %v162_v22 = vld [vmem:[#allocation2 + $0x8] sm:$0xff]  ;;  %v256_v26 = vunpack.c.0.s8 %v255_v24 }
  0x3c   :  { %361 = vmatprep.subr.bf16.mxu0 %v489_v0  ;;  %369 = vmatprep.subr.bf16.mxu1 %v368_v10  ;;  %v79_v20 = vld [vmem:[%s608_s1] sm:$0x3]  ;;  %v376_v21 = vpack.c.bf16 %v72_v19, %v71_v18 }
  0x3d   :  { %355 = vmatprep.mubr.msk.f32.mxu1 %vm169_vm1, %v161_v16  ;;  %v308_v28 = vld [vmem:[%s612_s5] ss:$0 sm:$0xff]  ;;  %v259_v31 = vsub.s32 %v256_v26, %v258_v27  ;;  %s493_s5 = smov [#allocation8]  }
  0x3e   :  { %v310_v35 = vld [vmem:[%s610_s3] ss:$0 sm:$0xff]  ;;  %s295_s15 = sshll.u32 %s493_s5, 4  ;;  %s296_s15 = int_to_ptr.vmem [resolvable:$true] %s295_s15 }
  0x3f   :  { %363 = vmatpush3.bf16.msra.mxu0 %v362_v15  ;;  %371 = vmatpush3.bf16.msra.mxu1 %v368_v10  ;;  %s456_s3 = scalar_lea.vmem %s296_s15, 256  ;;  %p461_p11 = scmp.lt.s32.totalorder %s296_s15, %s296_s15 }
  0x40   :  { %373 = vmatprep.subr.bf16.mxu1 %v372_v17  ;;  %p457_p10 = scmp.ne.s32.totalorder %s296_s15, %s456_s3  ;;  %p462_p12 = scmp.lt.s32.totalorder %s456_s3, %s456_s3 }
  0x42   :  { %337 = vmatmul.mubr.msk.f32.vlgmr.msra.gmra.mrb[0].mxu0 %vm86_vm2, %v79_v20  ;;  %p463_p13 = por %p462_p12, %p461_p11 }
  0x43   :  { %375 = vmatpush3.bf16.msra.mxu1 %v372_v17 }
  0x44   :  { %377 = vmatprep.subr.bf16.mxu1 %v376_v21  ;;  %p464_p0 = pnand %p463_p13, %p457_p10 }
  0x47   :  { %379 = vmatpush3.bf16.msra.mxu1 %v376_v21 }
  0x4a   :  { %356 = vmatmul.mubr.msk.f32.vlgmr.msra.gmra.mrb[0].mxu1 %vm169_vm1, %v162_v22 }
 0x115   :  { %v156_v29 = vpop.f32.mrb[0].mxu0 }
 0x116   :  { %v157_v30 = vadd.f32 %v308_v28, %v156_v29  ;;  %v338_v32 = vpop.f32.mrb[1].mxu0 }
 0x118   :  { %v160_v33 = vmax.f32 %v157_v30, 0.0 }
 0x11a   :  { %v260_v34 = vrot.slane %v160_v33, %v259_v31 }
 0x11c   :  { %v261_v36 = vcombine.high %v260_v34, %v260_v34  ;;  %v268_v38 = vrot.slane %v260_v34, %v259_v31 }
 0x11d   :  { %v357_v39 = vpop.f32.mrb[0].mxu1 }
 0x11e   :  { %v248_v40 = vadd.f32 %v357_v39, %v310_v35  ;;  %v275_v41 = vrot.slane %v261_v36, %v259_v31  ;;  %v242_v42 = vpop.f32.mrb[1].mxu1  ;;  %v279_v47 = vrot.slane %v268_v38, %v278_v37 }
 0x11f   :  { %v243_v43 = vadd.f32 %v310_v35, %v242_v42 }
 0x120   :  { %v252_v44 = vmax.f32 %v248_v40, 0.0  ;;  %v283_v45 = vrot.slane %v275_v41, %v278_v37 }
 0x121   :  { %v251_v46 = vmax.f32 %v243_v43, 0.0 }
 0x122   :  { %v287_v48 = vmul.f32 %v283_v45, %v252_v44 }
 0x123   :  { %v286_v49 = vmul.f32 %v279_v47, %v251_v46 }
 0x124   :  { %289 = vst [vmem:[#allocation8 + $0x8] sm:$0xff] %v287_v48 }
 0x125   :  { %288 = vst [vmem:[#allocation8] sm:$0xff] %v286_v49 }
 0x126   :  { %467 = shalt.err (!%p464_p0)
}
 0x127   :  { %s468_s18 = scalar_lea.hbm %s613_s6, 256 }
 0x128   :  { %p469_p1 = scmp.ne.s32.totalorder %s613_s6, %s468_s18  ;;  %p472_p2 = scmp.lt.u32.totalorder %s468_s18, %s613_s6 }
 0x12a   :  { %p474_p3 = pnand %p472_p2, %p469_p1 }
 0x12c   :  { %477 = shalt.err (!%p474_p3)
}
 0x12d   :  { %301 = dma.vmem_to_hbm [thread:$0]  %s296_s15, 256, %s613_s6, [#allocation4], %s486_s9, %s486_s9, %s487_s10  }
 0x12e   :  { %482 = dma.done.wait [#allocation4], 256  }
 0x12f   :  { %483 = vsyncadd [#allocation4], 4294967040 }
 0x130   :  { %305 = vsyncpa [#allocation3], 1 }
 0x131   :  { %306 = vsyncpa [#allocation6], 1 }
 0x132   :  { %307 = vsyncpa [#allocation4], 1 }

</bundles_post_ra>
